<compile_context>
chip_gen: v6e
topology: v6e:2x2x1
jax: 0.10.0
libtpu: 0.0.40
codegen_flags: <defaults>
</compile_context>

<pallas_src>
import jax
import jax.numpy as jnp
from jax.experimental import pallas as pl
from jax.experimental.pallas import tpu as pltpu

_LANE = 128
_MAX_COLS = 64 * _LANE                  # cap lane width at 8192
_TARGET_BLOCK_BYTES = 4 * 1024 * 1024   # ~4 MiB blocks -> ~86% of HBM roofline


def _relu_kernel(x_ref, o_ref):
    # Single elementwise max on the whole VMEM tile (VPU); memory-bound.
    o_ref[...] = jnp.maximum(x_ref[...], jnp.zeros((), x_ref.dtype))


def _sublane_pack(dtype):
    """Rows per packed sublane tile: 8 (32-bit), 16 (16-bit), 32 (8-bit)."""
    itemsize = jnp.dtype(dtype).itemsize
    return 8 * max(1, 4 // itemsize)


def _best_cols(n):
    """Pick the column count for the flat 2D slab.

    Prefer the widest multiple-of-128 divisor of n (lane-dense, unmasked vst,
    no padding). If none exists, fall back to the widest divisor at all (block
    lane dim == full array dim, so the (8,128) rule is waived). Returns None
    only when no reasonable divisor exists (then the caller pads).
    """
    cap = min(n, _MAX_COLS)
    best = 0
    c = _LANE
    while c <= cap:
        if n % c == 0:
            best = c
        c += _LANE
    if best:
        return best
    for c in range(cap, 7, -1):
        if n % c == 0:
            return c
    return None


def _choose_block_rows(rows, cols, itemsize, sub):
    """Block row count: ~4 MiB blocks, >=2 grid steps on big slabs, sublane-aligned."""
    bytes_per_row = cols * itemsize
    slab_bytes = rows * bytes_per_row
    target_bytes = _TARGET_BLOCK_BYTES
    if slab_bytes > 2 * 1024 * 1024:
        # Give the v7x megacore at least two grid steps once the slab matters.
        target_bytes = min(target_bytes, max(1, slab_bytes // 2))
    target_rows = max(1, target_bytes // bytes_per_row)
    if target_rows >= rows:
        return rows                       # single block == full array dims (waiver)
    block_rows = max(sub, (target_rows // sub) * sub)
    return min(block_rows, rows)


def guided_backprop_relu_forward(x):
    """Forward of GuidedBackpropReLUasModule: ReLU(x), any shape, same dtype."""
    orig_shape = x.shape
    dtype = x.dtype
    n = x.size
    if n == 0:
        return x
    itemsize = jnp.dtype(dtype).itemsize
    sub = _sublane_pack(dtype)

    cols = _best_cols(n)
    padded = cols is None
    if padded:
        # Safety net for pathological sizes (e.g. near-prime numel): pad the
        # flat buffer to a dtype-aware (sub, 128) tile multiple.
        tile = sub * _LANE
        n_pad = ((n + tile - 1) // tile) * tile
        x_flat = jnp.pad(jnp.ravel(x), (0, n_pad - n))
        cols = _best_cols(n_pad)
        rows = n_pad // cols
    else:
        x_flat = jnp.ravel(x)             # free reshape, no data movement
        rows = n // cols

    x2d = x_flat.reshape(rows, cols)
    block_rows = _choose_block_rows(rows, cols, itemsize, sub)
    grid = (pl.cdiv(rows, block_rows),)   # ragged last block is masked by Pallas

    out2d = pl.pallas_call(
        _relu_kernel,
        out_shape=jax.ShapeDtypeStruct((rows, cols), dtype),
        grid_spec=pltpu.PrefetchScalarGridSpec(
            num_scalar_prefetch=0,
            grid=grid,
            in_specs=[pl.BlockSpec((block_rows, cols), lambda i: (i, 0))],
            out_specs=pl.BlockSpec((block_rows, cols), lambda i: (i, 0)),
        ),
        input_output_aliases={0: 0},      # in-place ReLU on the slab
        compiler_params=pltpu.CompilerParams(
            dimension_semantics=("parallel",),
        ),
    )(x2d)

    out_flat = out2d.reshape(-1)
    if padded:
        out_flat = out_flat[:n]
    return out_flat.reshape(orig_shape)


if __name__ == "__main__":
    key = jax.random.PRNGKey(0)
    # Small NCHW input consistent with a conv-activation tensor.
    x = jax.random.normal(key, (2, 4, 16, 16), dtype=jnp.float32)

    fwd = jax.jit(guided_backprop_relu_forward)
    out = jax.block_until_ready(fwd(x))

    # Sanity check against plain JAX ReLU.
    ref = jnp.maximum(x, 0.0)
    assert out.shape == x.shape and out.dtype == x.dtype
    assert jnp.allclose(out, ref), "mismatch vs reference ReLU"

    print("KERNEL_OK")
</pallas_src>

<mosaic_0001>
module attributes {stable_mosaic.version = 11 : i64} {
  func.func @_relu_kernel(%arg0: i32, %arg1: memref<1x2048xf32, #tpu.memory_space<vmem>>, %arg2: memref<1x2048xf32, #tpu.memory_space<vmem>>) attributes {dimension_semantics = [#tpu.dimension_semantics<parallel>], iteration_bounds = array<i64: 1>, scalar_prefetch = 0 : i64, scratch_operands = 0 : i64, tpu.core_type = #tpu.core_type<tc>, window_params = [{transform_indices = @transform_0, window_bounds = array<i64: 1, 2048>}, {transform_indices = @transform_1, window_bounds = array<i64: 1, 2048>}]} {
    %c0 = arith.constant 0 : index
    %c0_0 = arith.constant 0 : index
    %0 = vector.load %arg1[%c0, %c0_0] : memref<1x2048xf32, #tpu.memory_space<vmem>>, vector<1x2048xf32>
    %cst = arith.constant 0.000000e+00 : f32
    %1 = vector.broadcast %cst : f32 to vector<1x2048xf32>
    %2 = arith.maximumf %0, %1 : vector<1x2048xf32>
    %c0_1 = arith.constant 0 : index
    %c0_2 = arith.constant 0 : index
    %3 = vector.load %arg2[%c0_1, %c0_2] : memref<1x2048xf32, #tpu.memory_space<vmem>>, vector<1x2048xf32>
    tpu.vector_store %arg2[%c0_1, %c0_2], %2 {strides = array<i32>} : memref<1x2048xf32, #tpu.memory_space<vmem>>, vector<1x2048xf32>,
    return
  }
  func.func @transform_0(%arg0: i32) -> (i32, i32) {
    %c0_i32 = arith.constant 0 : i32
    %c0_i32_0 = arith.constant 0 : i32
    return %arg0, %c0_i32 : i32, i32
  }
  func.func @transform_1(%arg0: i32) -> (i32, i32) {
    %c0_i32 = arith.constant 0 : i32
    %c0_i32_0 = arith.constant 0 : i32
    return %arg0, %c0_i32 : i32, i32
  }
}

</mosaic_0001>

<bundles_post_ra>
// kernel: guided_backprop_relu_forward.1
= control target key start
LH: loop header
LB: loop body
LE: loop exit
PB: predicated region body
PF: predicated region fallthrough
CT: control target
= control target key end

     0   :  { %s40_s0 = inlined_call_operand.vmem [shape: f32[1,2048], index: 0, kind: input, shape index: {}, may-alias: {0,1}]   ;;  %s41_s1 = inlined_call_operand.vmem [shape: f32[1,2048], index: 1, kind: output, shape index: {}, may-alias: {0,1}]  }
   0x1   :  { %v8_v0 = vld [vmem:[%s40_s0] sm:$0xff]  ;;  %v9_v1 = vld [vmem:[%s40_s0 + $0x8] sm:$0xff] }
   0x2   :  { %v10_v2 = vmax.f32 %v8_v0, 0.0  ;;  %v11_v3 = vmax.f32 %v9_v1, 0.0 }
   0x4   :  { %12 = vst [vmem:[%s41_s1] sm:$0xff] %v10_v2  ;;  %13 = vst [vmem:[%s41_s1 + $0x8] sm:$0xff] %v11_v3 }

</bundles_post_ra>
